<compile_context>
chip_gen: v7x
topology: tpu7x:2x2x1
jax: 0.10.0
libtpu: 0.0.40
codegen_flags: <defaults>
</compile_context>

<pallas_src>
import jax
import jax.numpy as jnp
from jax.experimental import pallas as pl
from jax.experimental.pallas import tpu as pltpu


def _round_up(x, m):
    return ((x + m - 1) // m) * m


def _make_kernel(n_nodes, n_feats, n_out, tn, tiles_per_core, b_pad, normalize):
    def kernel(feats_ref, batch_ref, wt_ref, b_ref, out_ref, iota_ref):
        i = pl.program_id(1)

        # Zero the per-core resident output slab and build the grid-invariant
        # graph iota once per node sweep of this core.
        @pl.when(i == 0)
        def _():
            out_ref[...] = jnp.zeros_like(out_ref)
            iota_ref[...] = jax.lax.broadcasted_iota(jnp.int32, (b_pad, tn), 0)

        # UNCLAMPED global tile index (index_maps clamp the DMA; here we want
        # the true offset so overhang / partial-tail rows get masked to zero).
        tile = pl.program_id(0) * tiles_per_core + i
        start = tile * tn

        col_ids = jax.lax.broadcasted_iota(jnp.int32, (tn, 1), 0) + start
        row_ids = jax.lax.broadcasted_iota(jnp.int32, (1, tn), 1) + start

        # Mask invalid rows BEFORE any math so garbage (possibly NaN) bytes
        # from partial tiles cannot reach the accumulator.
        feats = jnp.where(col_ids < n_nodes, feats_ref[...], 0.0)     # [tn, F]
        batch = jnp.where(row_ids < n_nodes, batch_ref[...], b_pad)   # [1, tn]

        # Node weights [tn, O]; both operands already in native MXU layout
        # (lhs contracts its lane dim F, rhs contracts its sublane dim F).
        logits = jnp.dot(feats, wt_ref[...],
                         preferred_element_type=jnp.float32) + b_ref[...]
        weights = jax.nn.sigmoid(logits) if normalize else logits     # [tn, O]

        # wf[i, o*F + f] = weights[i, o] * feats[i, f]  -> [tn, O*F]
        # (O is tiny — static Python unroll is fine.)
        wf = jnp.concatenate(
            [feats * weights[:, o:o + 1] for o in range(n_out)], axis=1)

        # One-hot graph membership, nodes on lanes: [b_pad, tn]; padded /
        # invalid rows carry the sentinel b_pad and hit no graph row.
        onehot = (iota_ref[...] == batch).astype(jnp.float32)

        # Fused scatter-add: one MXU matmul per tile, accumulated in VMEM.
        out_ref[...] += jnp.dot(onehot, wf, preferred_element_type=jnp.float32)

    return kernel


def pool_weighted_sum(feats, batch, w, b, n_graphs, *, normalize=True,
                      max_node_tile=8192):
    """feats [N, F], batch [N] int, w [O, F], b [O] -> [n_graphs, O*F]."""
    n_nodes, n_feats = feats.shape
    n_out = w.shape[0]
    of = n_out * n_feats
    b_pad = _round_up(max(n_graphs, 1), 8)

    # Node tile: as large as a modest VMEM budget allows, clamped to a
    # multiple of 128 (block constraint).  Small inputs use a single
    # full-extent block (no padding, no partial blocks).
    tile_cap = max(128, (int(max_node_tile) // 128) * 128)
    row_bytes = 4 * (3 * n_feats + n_out * n_feats + n_out + 3 * b_pad + 8)
    budget_rows = max(128, ((16 * 1024 * 1024) // row_bytes) // 128 * 128)
    tile_cap = min(tile_cap, budget_rows)
    tn = n_nodes if n_nodes <= tile_cap else tile_cap

    tiles_total = pl.cdiv(n_nodes, tn)
    # Leading "parallel" axis: shards the node range across the 2 TensorCores
    # of a v7x chip; on 1-TC chips it is just a (cheap) outer serial loop.
    n_cores = 2 if tiles_total > 1 else 1
    tiles_per_core = pl.cdiv(tiles_total, n_cores)

    feats_f = feats.astype(jnp.float32)                    # no shape padding
    batch_row = batch.reshape(1, n_nodes).astype(jnp.int32)
    w_t = jnp.transpose(w).astype(jnp.float32)             # [F, O]
    b_row = b.reshape(1, n_out).astype(jnp.float32)        # [1, O]

    def node_block(c, i):
        t = jnp.minimum(c * tiles_per_core + i, tiles_total - 1)
        return (t, 0)

    def batch_block(c, i):
        t = jnp.minimum(c * tiles_per_core + i, tiles_total - 1)
        return (0, t)

    kernel = _make_kernel(n_nodes, n_feats, n_out, tn, tiles_per_core,
                          b_pad, normalize)

    out_p = pl.pallas_call(
        kernel,
        out_shape=jax.ShapeDtypeStruct((n_cores, b_pad, of), jnp.float32),
        grid_spec=pltpu.PrefetchScalarGridSpec(
            num_scalar_prefetch=0,
            grid=(n_cores, tiles_per_core),
            in_specs=[
                pl.BlockSpec((tn, n_feats), node_block),        # feats tile
                pl.BlockSpec((1, tn), batch_block),             # batch tile
                pl.BlockSpec((n_feats, n_out), lambda c, i: (0, 0)),  # W^T
                pl.BlockSpec((1, n_out), lambda c, i: (0, 0)),        # bias
            ],
            out_specs=pl.BlockSpec((None, b_pad, of), lambda c, i: (c, 0, 0)),
            scratch_shapes=[pltpu.VMEM((b_pad, tn), jnp.int32)],  # graph iota
        ),
        compiler_params=pltpu.CompilerParams(
            dimension_semantics=("parallel", "arbitrary"),
            vmem_limit_bytes=48 * 1024 * 1024,
        ),
    )(feats_f, batch_row, w_t, b_row)

    # Sum per-core slabs (no-op content-wise for 1 core) and strip graph pad.
    return out_p.sum(axis=0)[:n_graphs]


def _reference(feats, batch, w, b, n_graphs):
    weights = jax.nn.sigmoid(feats @ w.T + b[None, :])            # [N, O]
    wf = jnp.einsum('io,if->iof', weights, feats).reshape(feats.shape[0], -1)
    return jax.ops.segment_sum(wf, batch, num_segments=n_graphs)


if __name__ == "__main__":
    key = jax.random.PRNGKey(0)

    # --- small test (single full-extent block, no grid tiling) ---
    k_feats, k_w, k_b = jax.random.split(key, 3)
    N, F, O, B = 16, 32, 2, 3      # nodes, in-feats, out-feats, graphs
    feats = jax.random.normal(k_feats, (N, F), dtype=jnp.float32)
    batch = jnp.array([0] * 6 + [1] * 5 + [2] * 5, dtype=jnp.int32)
    w = jax.random.normal(k_w, (O, F), dtype=jnp.float32) * 0.1
    b = jax.random.normal(k_b, (O,), dtype=jnp.float32) * 0.1

    out = jax.block_until_ready(pool_weighted_sum(feats, batch, w, b, n_graphs=B))
    ref = _reference(feats, batch, w, b, n_graphs=B)
    assert out.shape == (B, O * F)
    assert jnp.allclose(out, ref, atol=1e-4, rtol=1e-4), "mismatch (small)"

    # --- larger inputs, default tile: single unaligned full-extent block ---
    k_f2, k_b2i, k_w2, k_bb2 = jax.random.split(jax.random.PRNGKey(0), 4)
    N2, F2, O2, B2 = 700, 32, 2, 5
    feats2 = jax.random.normal(k_f2, (N2, F2), dtype=jnp.float32)
    batch2 = jax.random.randint(k_b2i, (N2,), 0, B2, dtype=jnp.int32)
    w2 = jax.random.normal(k_w2, (O2, F2), dtype=jnp.float32) * 0.1
    b2 = jax.random.normal(k_bb2, (O2,), dtype=jnp.float32) * 0.1

    out2 = jax.block_until_ready(pool_weighted_sum(feats2, batch2, w2, b2, n_graphs=B2))
    ref2 = _reference(feats2, batch2, w2, b2, n_graphs=B2)
    assert out2.shape == (B2, O2 * F2)
    assert jnp.allclose(out2, ref2, atol=1e-3, rtol=1e-3), "mismatch (single tile)"

    # --- forced multi-tile: exercises grid, core split, tile-size rounding,
    #     partial tail block and the clamped overhang tile ---
    out3 = jax.block_until_ready(
        pool_weighted_sum(feats2, batch2, w2, b2, n_graphs=B2, max_node_tile=300))
    assert jnp.allclose(out3, ref2, atol=1e-3, rtol=1e-3), "mismatch (tiled)"

    print("KERNEL_OK")
</pallas_src>

<mosaic_0001>
module attributes {stable_mosaic.version = 11 : i64} {
  func.func @kernel(%arg0: i32, %arg1: i32, %arg2: memref<16x32xf32, #tpu.memory_space<vmem>>, %arg3: memref<1x16xi32, #tpu.memory_space<vmem>>, %arg4: memref<32x2xf32, #tpu.memory_space<vmem>>, %arg5: memref<1x2xf32, #tpu.memory_space<vmem>>, %arg6: memref<1x8x64xf32, #tpu.memory_space<vmem>>, %arg7: memref<8x16xi32, #tpu.memory_space<vmem>>) attributes {dimension_semantics = [#tpu.dimension_semantics<parallel>, #tpu.dimension_semantics<arbitrary>], iteration_bounds = array<i64: 1, 1>, scalar_prefetch = 0 : i64, scratch_operands = 1 : i64, tpu.core_type = #tpu.core_type<tc>, window_params = [{transform_indices = @transform_0, window_bounds = array<i64: 16, 32>}, {transform_indices = @transform_1, window_bounds = array<i64: 1, 16>}, {pipeline_mode = #tpu.pipeline_mode<synchronous>, transform_indices = @transform_2, window_bounds = array<i64: 32, 2>}, {pipeline_mode = #tpu.pipeline_mode<synchronous>, transform_indices = @transform_3, window_bounds = array<i64: 1, 2>}, {transform_indices = @transform_4, window_bounds = array<i64: 1, 8, 64>}]} {
    %c0_i32 = arith.constant 0 : i32
    %0 = arith.cmpi eq, %arg1, %c0_i32 : i32
    %1 = arith.extui %0 : i1 to i32
    %c0_i32_0 = arith.constant 0 : i32
    %2 = arith.cmpi ne, %1, %c0_i32_0 : i32
    scf.if %2 {
      %cst_21 = arith.constant 0.000000e+00 : f32
      %53 = vector.broadcast %cst_21 : f32 to vector<8x64xf32>
      %c0_22 = arith.constant 0 : index
      %c0_23 = arith.constant 0 : index
      %c0_24 = arith.constant 0 : index
      %54 = vector.load %arg6[%c0_22, %c0_23, %c0_24] : memref<1x8x64xf32, #tpu.memory_space<vmem>>, vector<1x8x64xf32>
      %55 = vector.shape_cast %54 : vector<1x8x64xf32> to vector<8x64xf32>
      %56 = vector.shape_cast %53 : vector<8x64xf32> to vector<1x8x64xf32>
      tpu.vector_store %arg6[%c0_22, %c0_23, %c0_24], %56 {strides = array<i32>} : memref<1x8x64xf32, #tpu.memory_space<vmem>>, vector<1x8x64xf32>,
      %57 = tpu.iota {dimensions = array<i32: 0>} : vector<8x16xi32>
      %c0_25 = arith.constant 0 : index
      %c0_26 = arith.constant 0 : index
      %58 = vector.load %arg7[%c0_25, %c0_26] : memref<8x16xi32, #tpu.memory_space<vmem>>, vector<8x16xi32>
      tpu.vector_store %arg7[%c0_25, %c0_26], %57 {strides = array<i32>} : memref<8x16xi32, #tpu.memory_space<vmem>>, vector<8x16xi32>,
    } else {
    }
    %c1_i32 = arith.constant 1 : i32
    %3 = arith.muli %arg0, %c1_i32 : i32
    %4 = arith.addi %3, %arg1 : i32
    %c16_i32 = arith.constant 16 : i32
    %5 = arith.muli %4, %c16_i32 : i32
    %6 = tpu.iota {dimensions = array<i32: 0>} : vector<16x1xi32>
    %7 = vector.broadcast %5 : i32 to vector<16x1xi32>
    %8 = arith.addi %6, %7 : vector<16x1xi32>
    %9 = tpu.iota {dimensions = array<i32: 1>} : vector<1x16xi32>
    %10 = vector.broadcast %5 : i32 to vector<1x16xi32>
    %11 = arith.addi %9, %10 : vector<1x16xi32>
    %c16_i32_1 = arith.constant 16 : i32
    %12 = vector.broadcast %c16_i32_1 : i32 to vector<16x1xi32>
    %13 = arith.cmpi slt, %8, %12 : vector<16x1xi32>
    %c0 = arith.constant 0 : index
    %c0_2 = arith.constant 0 : index
    %14 = vector.load %arg2[%c0, %c0_2] : memref<16x32xf32, #tpu.memory_space<vmem>>, vector<16x32xf32>
    %cst = arith.constant 0.000000e+00 : f32
    %15 = vector.shape_cast %13 : vector<16x1xi1> to vector<16x1xi1>
    %16 = vector.broadcast %15 : vector<16x1xi1> to vector<16x32xi1>
    %17 = vector.broadcast %cst : f32 to vector<16x32xf32>
    %18 = arith.select %16, %14, %17 : vector<16x32xi1>, vector<16x32xf32>
    %c16_i32_3 = arith.constant 16 : i32
    %19 = vector.broadcast %c16_i32_3 : i32 to vector<1x16xi32>
    %20 = arith.cmpi slt, %11, %19 : vector<1x16xi32>
    %c0_4 = arith.constant 0 : index
    %c0_5 = arith.constant 0 : index
    %21 = vector.load %arg3[%c0_4, %c0_5] : memref<1x16xi32, #tpu.memory_space<vmem>>, vector<1x16xi32>
    %c8_i32 = arith.constant 8 : i32
    %22 = vector.broadcast %c8_i32 : i32 to vector<1x16xi32>
    %23 = arith.select %20, %21, %22 : vector<1x16xi1>, vector<1x16xi32>
    %c0_6 = arith.constant 0 : index
    %c0_7 = arith.constant 0 : index
    %24 = vector.load %arg4[%c0_6, %c0_7] : memref<32x2xf32, #tpu.memory_space<vmem>>, vector<32x2xf32>
    %cst_8 = arith.constant dense<0.000000e+00> : vector<16x2xf32>
    %25 = tpu.matmul %18, %24, %cst_8 {dimension_numbers = #tpu.dot_dimension_numbers<[1], [0], [0], [1], [0, 0, 1, 1], [], []>} : vector<16x32xf32>, vector<32x2xf32>, vector<16x2xf32> -> vector<16x2xf32>
    %c0_9 = arith.constant 0 : index
    %c0_10 = arith.constant 0 : index
    %26 = vector.load %arg5[%c0_9, %c0_10] : memref<1x2xf32, #tpu.memory_space<vmem>>, vector<1x2xf32>
    %27 = vector.broadcast %26 : vector<1x2xf32> to vector<16x2xf32>
    %28 = arith.addf %25, %27 : vector<16x2xf32>
    %29 = arith.negf %28 : vector<16x2xf32>
    %30 = math.exp %29 : vector<16x2xf32>
    %cst_11 = arith.constant 1.000000e+00 : f32
    %31 = vector.broadcast %cst_11 : f32 to vector<16x2xf32>
    %32 = arith.addf %31, %30 : vector<16x2xf32>
    %33 = arith.divf %31, %32 : vector<16x2xf32>
    %34 = vector.extract_strided_slice %33 {offsets = [0, 0], sizes = [16, 1], strides = [1, 1]} : vector<16x2xf32> to vector<16x1xf32>
    %35 = vector.broadcast %34 : vector<16x1xf32> to vector<16x32xf32>
    %36 = arith.mulf %18, %35 : vector<16x32xf32>
    %37 = vector.extract_strided_slice %33 {offsets = [0, 1], sizes = [16, 1], strides = [1, 1]} : vector<16x2xf32> to vector<16x1xf32>
    %38 = vector.broadcast %37 : vector<16x1xf32> to vector<16x32xf32>
    %39 = arith.mulf %18, %38 : vector<16x32xf32>
    %40 = tpu.concatenate %36, %39 in 1 : vector<16x32xf32>, vector<16x32xf32> -> vector<16x64xf32>
    %c0_12 = arith.constant 0 : index
    %c0_13 = arith.constant 0 : index
    %41 = vector.load %arg7[%c0_12, %c0_13] : memref<8x16xi32, #tpu.memory_space<vmem>>, vector<8x16xi32>
    %42 = vector.broadcast %23 : vector<1x16xi32> to vector<8x16xi32>
    %43 = arith.cmpi eq, %41, %42 : vector<8x16xi32>
    %44 = arith.extui %43 : vector<8x16xi1> to vector<8x16xi32>
    %45 = arith.sitofp %44 : vector<8x16xi32> to vector<8x16xf32>
    %c0_14 = arith.constant 0 : index
    %c0_15 = arith.constant 0 : index
    %c0_16 = arith.constant 0 : index
    %46 = vector.load %arg6[%c0_14, %c0_15, %c0_16] : memref<1x8x64xf32, #tpu.memory_space<vmem>>, vector<1x8x64xf32>
    %47 = vector.shape_cast %46 : vector<1x8x64xf32> to vector<8x64xf32>
    %cst_17 = arith.constant dense<0.000000e+00> : vector<8x64xf32>
    %48 = tpu.matmul %45, %40, %cst_17 {dimension_numbers = #tpu.dot_dimension_numbers<[1], [0], [0], [1], [0, 0, 1, 1], [], []>} : vector<8x16xf32>, vector<16x64xf32>, vector<8x64xf32> -> vector<8x64xf32>
    %49 = arith.addf %47, %48 : vector<8x64xf32>
    %c0_18 = arith.constant 0 : index
    %c0_19 = arith.constant 0 : index
    %c0_20 = arith.constant 0 : index
    %50 = vector.load %arg6[%c0_18, %c0_19, %c0_20] : memref<1x8x64xf32, #tpu.memory_space<vmem>>, vector<1x8x64xf32>
    %51 = vector.shape_cast %50 : vector<1x8x64xf32> to vector<8x64xf32>
    %52 = vector.shape_cast %49 : vector<8x64xf32> to vector<1x8x64xf32>
    tpu.vector_store %arg6[%c0_18, %c0_19, %c0_20], %52 {strides = array<i32>} : memref<1x8x64xf32, #tpu.memory_space<vmem>>, vector<1x8x64xf32>,
    return
  }
  func.func @transform_0(%arg0: i32, %arg1: i32) -> (i32, i32) {
    %c1_i32 = arith.constant 1 : i32
    %0 = arith.muli %arg0, %c1_i32 : i32
    %1 = arith.addi %0, %arg1 : i32
    %c0_i32 = arith.constant 0 : i32
    %2 = arith.minsi %1, %c0_i32 : i32
    %c0_i32_0 = arith.constant 0 : i32
    %c0_i32_1 = arith.constant 0 : i32
    return %2, %c0_i32_0 : i32, i32
  }
  func.func @transform_1(%arg0: i32, %arg1: i32) -> (i32, i32) {
    %c1_i32 = arith.constant 1 : i32
    %0 = arith.muli %arg0, %c1_i32 : i32
    %1 = arith.addi %0, %arg1 : i32
    %c0_i32 = arith.constant 0 : i32
    %2 = arith.minsi %1, %c0_i32 : i32
    %c0_i32_0 = arith.constant 0 : i32
    %c0_i32_1 = arith.constant 0 : i32
    return %c0_i32_0, %2 : i32, i32
  }
  func.func @transform_2(%arg0: i32, %arg1: i32) -> (i32, i32) {
    %c0_i32 = arith.constant 0 : i32
    %c0_i32_0 = arith.constant 0 : i32
    %c0_i32_1 = arith.constant 0 : i32
    return %c0_i32, %c0_i32_0 : i32, i32
  }
  func.func @transform_3(%arg0: i32, %arg1: i32) -> (i32, i32) {
    %c0_i32 = arith.constant 0 : i32
    %c0_i32_0 = arith.constant 0 : i32
    %c0_i32_1 = arith.constant 0 : i32
    return %c0_i32, %c0_i32_0 : i32, i32
  }
  func.func @transform_4(%arg0: i32, %arg1: i32) -> (i32, i32, i32) {
    %c0_i32 = arith.constant 0 : i32
    %c0_i32_0 = arith.constant 0 : i32
    %c0_i32_1 = arith.constant 0 : i32
    return %arg0, %c0_i32, %c0_i32_0 : i32, i32, i32
  }
}

</mosaic_0001>

<bundles_post_ra>
// kernel: tpu_custom_call.1
= control target key start
LH: loop header
LB: loop body
LE: loop exit
PB: predicated region body
PF: predicated region fallthrough
CT: control target
= control target key end

     0   :  { %vm119_vm0 = vcmask 261120   ;;  %s526_s0 = inlined_call_operand.vmem [shape: f32[16,32], index: 0, kind: input, shape index: {}]   ;;  %s527_s1 = inlined_call_operand.vmem [shape: s32[1,16], index: 1, kind: input, shape index: {}]   ;;  %s528_s2 = inlined_call_operand.vmem [shape: f32[32,2], index: 2, kind: input, shape index: {}]   ;;  %s529_s3 = inlined_call_operand.vmem [shape: f32[1,2], index: 3, kind: input, shape index: {}]   ;;  %s530_s4 = inlined_call_operand.hbm [shape: f32[1,8,64], index: 4, kind: output, shape index: {}]  }
   0x1   :  { %v108_v0 = vld [vmem:[%s528_s2] sm:$0xff]  ;;  %v109_v1 = vld [vmem:[%s528_s2 + $0x8] sm:$0xff]  ;;  %v110_v2 = vld [vmem:[%s528_s2 + $0x10] sm:$0xff] }
   0x2   :  { %v388_v3 = vpack.c.bf16 %v109_v1, %v108_v0  ;;  %v111_v4 = vld [vmem:[%s528_s2 + $0x18] sm:$0xff]  ;;  %v492_v5 = vld [vmem:[%s526_s0] sm:$0xff] }
   0x3   :  { %v392_v6 = vpack.c.bf16 %v111_v4, %v110_v2  ;;  %378 = vmatprep.mubr.msk.f32.mxu0 %vm119_vm0, %v492_v5 }
   0x4   :  { %9 = vsyncpa [#allocation4], 0  ;;  %389 = vmatprep.subr.bf16.mxu0 %v388_v3  ;;  %v98_v7 = vld [vmem:[%s526_s0 + $0x8] sm:$0xff]  ;;  %v445_v8 = vmov 1   ;;  %v446_v9 = vmov 0   ;;  %v80_v23 = vlaneseq  ;;  %vm82_vm1 = vcmask 130048  }
   0x5   :  { %391 = vmatpush3.bf16.msra.mxu0 %v388_v3  ;;  %406 = vset.pattern.permute.xlu0 %v445_v8  ;;  %v354_v10 = vld [vmem:[%s529_s3] ss:$0 sm:$0xff]  ;;  %v447_v26 = vmov 0.0|0.0   ;;  %vm78_vm3 = vcmask 523264   ;;  %v448_v33 = vmov 0.0   ;;  %vm449_vm5 = vmmov 0  }
   0x6   :  { %393 = vmatprep.subr.bf16.mxu0 %v392_v6  ;;  %407 = vset.pattern.permute.xlu1 %v446_v9  ;;  %v81_v24 = vshrl.u32 %v80_v23, 7  ;;  %v93_v25 = vand.u32 127, %v80_v23  ;;  %v106_v27 = vld [vmem:[%s527_s1] sm:$0x1]  ;;  %79 = vst.msk [vmem:[#allocation3] sm:$0xff] %vm78_vm3, %v448_v33  ;;  %s450_s28 = smov 32  }
   0x7   :  { %396 = vmatprep.subr.bf16.mxu1 %v447_v26  ;;  %385 = vmatprep.mubr.msk.f32.mxu1 %vm449_vm5, %v448_v33  ;;  %s451_s1 = smov [#allocation3]  }
   0x8   :  { %83 = vst.msk [vmem:[#allocation2] sm:$0xff] %vm82_vm1, %v81_v24  ;;  %vm105_vm2 = vcmp.lt.s32.totalorder %v93_v25, 16  ;;  %v248_v28 = vsub.s32 0, %v81_v24  ;;  %s337_s29 = sshll.u32 %s451_s1, 4  ;;  %s338_s29 = int_to_ptr.vmem [resolvable:$true] %s337_s29 }
   0x9   :  { %395 = vmatpush3.bf16.msra.mxu0 %v392_v6  ;;  %v107_v29 = vsel %vm105_vm2, %v106_v27, 8  ;;  %s421_s30 = scalar_lea.vmem %s338_s29, 128  ;;  %p426_p1 = scmp.lt.s32.totalorder %s338_s29, %s338_s29 }
   0xa   :  { %v249_v31 = vrot.slane %v107_v29, %v248_v28  ;;  %p422_p0 = scmp.ne.s32.totalorder %s338_s29, %s421_s30  ;;  %p427_p2 = scmp.lt.s32.totalorder %s421_s30, %s421_s30 }
   0xc   :  { %379 = vmatmul.mubr.msk.f32.vlgmr.msra.gmra.mrb[0].mxu0 %vm119_vm0, %v98_v7  ;;  %p428_p3 = por %p427_p2, %p426_p1 }
   0xd   :  { %v253_v49 = vld [vmem:[#allocation3] sm:$0xff] }
   0xe   :  { %p429_p4 = pnand %p428_p3, %p422_p0 }
   0xf   :  { %v245_v32 = vld [vmem:[#allocation2] sm:$0xff] }
  0x10   :  { %vm250_vm4 = vcmp.eq.s32.totalorder %v245_v32, %v249_v31 }
  0x11   :  { %v359_v34 = vsel %vm250_vm4, 1.0, %v448_v33 }
  0xdf   :  { %v380_v11 = vpop.f32.mrb[0].mxu0 }
  0xe0   :  { %v198_v12 = vadd.f32 %v380_v11, %v354_v10  ;;  %v192_v13 = vpop.f32.mrb[1].mxu0 }
  0xe1   :  { %v193_v14 = vadd.f32 %v354_v10, %v192_v13 }
  0xe2   :  { %v358_v15 = vmul.f32 -1.442695, %v198_v12 }
  0xe3   :  { %v357_v16 = vmul.f32 -1.442695, %v193_v14 }
  0xe4   :  { %413 = vpow2.f32 %v358_v15 }
  0xe5   :  { %415 = vpow2.f32 %v357_v16 }
  0xee   :  { %v414_v17 = vpop.eup %413 }
  0xef   :  { %v416_v18 = vpop.eup %415  ;;  %v208_v20 = vadd.f32 1.0, %v414_v17 }
  0xf0   :  { %v207_v19 = vadd.f32 1.0, %v416_v18 }
  0xf2   :  { %417 = vrcp.f32 %v207_v19 }
  0xf3   :  { %419 = vrcp.f32 %v208_v20 }
  0xfc   :  { %v418_v21 = vpop.eup %417 }
  0xfd   :  { %215 = vperm.xlu1 %407, %v418_v21   ;;  %226 = vperm.xlu0 %406, %v418_v21   ;;  %v420_v22 = vpop.eup %419 }
 0x101   :  { %220 = vperm.xlu1 %407, %v420_v22   ;;  %230 = vperm.xlu0 %406, %v420_v22  }
 0x17c   :  { %v227_v30 = vpop.permute.xlu0 %226  ;;  %v216_v39 = vpop.permute.xlu1 %215 }
 0x17d   :  { %v233_v36 = vmul.f32 %v227_v30, %v492_v5  ;;  %v223_v42 = vmul.f32 %v216_v39, %v492_v5 }
 0x180   :  { %v231_v35 = vpop.permute.xlu0 %230  ;;  %v221_v40 = vpop.permute.xlu1 %220 }
 0x181   :  { %v234_v37 = vmul.f32 %v231_v35, %v98_v7  ;;  %v224_v43 = vmul.f32 %v221_v40, %v98_v7 }
 0x183   :  { %v408_v38 = vpack.i.bf16 %v234_v37, %v233_v36 }
 0x185   :  { %409 = vrot.lane.b32.xlu0 %v408_v38, %s450_s28 }
 0x1f7   :  { %v410_v41 = vpop.permute.xlu0 %409 }
 0x1f8   :  { %v412_v44 = vunpack.i.h.bf16 %v410_v41  ;;  %v411_v45 = vunpack.i.l.bf16 %v410_v41 }
 0x1fa   :  { %v243_v46 = vsel %vm119_vm0, %v223_v42, %v411_v45  ;;  %v244_v47 = vsel %vm119_vm0, %v224_v43, %v412_v44 }
 0x1fb   :  { %v397_v48 = vpack.c.bf16 %v244_v47, %v243_v46 }
 0x1fd   :  { %398 = vmatpush3.bf16.msra.mxu1 %v397_v48 }
 0x200   :  { %386 = vmatmul.mubr.msk.f32.vlgmr.msra.gmra.mrb[0].mxu1 %vm82_vm1, %v359_v34 }
 0x2d3   :  { %v324_v50 = vpop.f32.mrb[0].mxu1 }
 0x2d4   :  { %v328_v51 = vadd.f32 %v324_v50, %v253_v49  ;;  %v387_v52 = vpop.f32.mrb[1].mxu1 }
 0x2d6   :  { %330 = vst.msk [vmem:[#allocation3] sm:$0xff] %vm78_vm3, %v328_v51 }
 0x2d7   :  { %432 = shalt.err (!%p429_p4)
}
 0x2d8   :  { %s433_s7 = scalar_lea.hbm %s530_s4, 128 }
 0x2d9   :  { %p434_p5 = scmp.ne.s32.totalorder %s530_s4, %s433_s7  ;;  %p437_p6 = scmp.lt.u32.totalorder %s433_s7, %s530_s4 }
 0x2db   :  { %p439_p7 = pnand %p437_p6, %p434_p5 }
 0x2dd   :  { %442 = shalt.err (!%p439_p7)
}
 0x2de   :  { %340 = dma.vmem_to_hbm [thread:$0]  %s338_s29, 128, %s530_s4, [#allocation4]  }
 0x2df   :  { %443 = dma.done.wait [#allocation4], 128  }
 0x2e0   :  { %444 = vsyncadd [#allocation4], 4294967168 }
 0x2e1   :  { %344 = vsyncpa [#allocation4], 1 }

</bundles_post_ra>
